<compile_context>
chip_gen: v6e
topology: v6e:2x2x1
jax: 0.10.0
libtpu: 0.0.40
codegen_flags: <defaults>
</compile_context>

<pallas_src>
import jax
import jax.numpy as jnp
from jax import lax
from jax.experimental import pallas as pl
from jax.experimental.pallas import tpu as pltpu

LANE = 128   # TPU vreg lane width: feature (last) dims are multiples of this.
SUB = 16     # node-dim padding granularity (covers bf16 sublane packing).


def _round_up(x, m):
    return ((x + m - 1) // m) * m


def _pad2(x, rows, cols):
    """Zero-pad a 2-D array up to (rows, cols) — layout-only, preserves math."""
    return jnp.pad(x, ((0, rows - x.shape[0]), (0, cols - x.shape[1])))


def classifier_kernel(nreal_ref, a_ref, h_ref, w1_ref, b1_ref, w2_ref, b2_ref,
                      wc_ref, bc_ref, y_ref):
    a = a_ref[...]                      # [Np, Np] bf16 (entries 0/1 -> exact)
    n_pad = a.shape[0]

    # Fused degree/norm computation.  in-degree = row sums of A, produced as a
    # [Np, 1] column via a plain bf16 MXU matmul against a ones vector (exact
    # integer sums accumulated in f32; no f32 copy of A, no transpose).
    ones = jnp.ones((n_pad, 1), jnp.bfloat16)
    deg = jnp.dot(a, ones, preferred_element_type=jnp.float32)       # [Np, 1]
    norm = lax.rsqrt(jnp.maximum(deg, 1.0))                          # [Np, 1] f32

    def sgconv(x, w_ref_, b_ref_):
        # Symmetric-normalized propagation.  bf16 on the MXU for the SpMM
        # (A is 0/1 so exact; activations get ~2^-9 relative rounding); the
        # elementwise scaling / bias / projection stay in f32.
        xs = (x * norm).astype(jnp.bfloat16)
        p = jnp.dot(a, xs, preferred_element_type=jnp.float32)       # [Np, F]
        p = p * norm
        return jnp.dot(p, w_ref_[...],
                       preferred_element_type=jnp.float32) + b_ref_[...]

    h1 = jnp.maximum(sgconv(h_ref[...], w1_ref, b1_ref), 0.0)        # [Np, 128]
    h2 = jnp.maximum(sgconv(h1, w2_ref, b2_ref), 0.0)                # [Np, 256p]

    # AvgPooling readout over the real nodes only (padded rows carry relu(bias)
    # and must be excluded).
    n_real = nreal_ref[0, 0]
    row_id = lax.broadcasted_iota(jnp.int32, (n_pad, 1), 0)
    valid = (row_id < n_real).astype(jnp.float32)                    # [Np, 1]
    hsum = jnp.sum(h2 * valid, axis=0, keepdims=True)                # [1, 256p]
    hg = hsum * (1.0 / n_real.astype(jnp.float32))

    # classify: nn.Linear(256, n_classes), lane-dense (padded to 128 outputs).
    y_ref[...] = jnp.dot(hg, wc_ref[...],
                         preferred_element_type=jnp.float32) + bc_ref[...]


def classifier_forward(adj, h, params):
    """adj: [N, N] float32 dense adjacency, h: [N, in_dim], params: dict."""
    n = adj.shape[0]
    in_dim = h.shape[1]
    hidden = params["w1"].shape[1]
    f2 = params["w2"].shape[1]          # 256
    n_classes = params["wc"].shape[1]

    n_p = _round_up(n, SUB)
    in_p = _round_up(in_dim, LANE)
    hid_p = _round_up(hidden, LANE)
    f2_p = _round_up(f2, LANE)
    out_p = _round_up(n_classes, LANE)

    # 0/1 adjacency: bf16 is exact and halves DMA bytes of the largest operand.
    adj_b = _pad2(adj, n_p, n_p).astype(jnp.bfloat16)

    # Layout-only zero padding so every feature (lane) dim is 128-aligned.
    h_p = _pad2(h.astype(jnp.float32), n_p, in_p)
    w1_p = _pad2(params["w1"], in_p, hid_p)
    b1_p = _pad2(params["b1"], 1, hid_p)
    w2_p = _pad2(params["w2"], hid_p, f2_p)
    b2_p = _pad2(params["b2"], 1, f2_p)
    wc_p = _pad2(params["wc"], f2_p, out_p)
    bc_p = _pad2(params["bc"], 1, out_p)
    n_real = jnp.full((1, 1), n, dtype=jnp.int32)

    flops = 2 * (n_p * n_p * (1 + in_p + hid_p)
                 + n_p * in_p * hid_p + n_p * hid_p * f2_p
                 + n_p * f2_p + f2_p * out_p)
    bytes_accessed = int(adj_b.size * 2
                         + sum(x.size * 4 for x in
                               (h_p, w1_p, b1_p, w2_p, b2_p, wc_p, bc_p))
                         + out_p * 4 + 4)

    vmem = pl.BlockSpec(memory_space=pltpu.MemorySpace.VMEM)
    smem = pl.BlockSpec(memory_space=pltpu.MemorySpace.SMEM)

    # All operands are single full VMEM blocks (a few hundred KiB at these
    # sizes).  # TODO(synk): for graphs with thousands of nodes, tile A with a
    # (parallel-rows, reduction) grid + VMEM accumulator and re-derive tile
    # sizes for v7x's 64 MiB VMEM / 2 TensorCores.
    y_pad = pl.pallas_call(
        classifier_kernel,
        out_shape=jax.ShapeDtypeStruct((1, out_p), jnp.float32),
        in_specs=[smem] + [vmem] * 8,
        out_specs=vmem,
        cost_estimate=pl.CostEstimate(flops=flops, transcendentals=n_p,
                                      bytes_accessed=bytes_accessed),
    )(n_real, adj_b, h_p, w1_p, b1_p, w2_p, b2_p, wc_p, bc_p)

    return y_pad[:, :n_classes]


def init_params(key, in_dim, hidden_dim, n_classes):
    """Deterministic init mimicking PyTorch Linear default (U(-k, k), k=1/sqrt(fan_in))."""
    ks = jax.random.split(key, 6)

    def lin(kw, kb, fan_in, fan_out):
        bound = 1.0 / jnp.sqrt(jnp.float32(fan_in))
        w = jax.random.uniform(kw, (fan_in, fan_out), jnp.float32, -bound, bound)
        b = jax.random.uniform(kb, (1, fan_out), jnp.float32, -bound, bound)
        return w, b

    w1, b1 = lin(ks[0], ks[1], in_dim, hidden_dim)
    w2, b2 = lin(ks[2], ks[3], hidden_dim, 256)
    wc, bc = lin(ks[4], ks[5], 256, n_classes)
    return dict(w1=w1, b1=b1, w2=w2, b2=b2, wc=wc, bc=bc)


if __name__ == "__main__":
    N = 16          # nodes in the graph
    IN_DIM = 32     # input feature dim (g.ndata['h'])
    HIDDEN = 64     # hidden_dim
    N_CLASSES = 10

    key = jax.random.PRNGKey(0)
    k_feat, k_param = jax.random.split(key)

    # Deterministic graph: ring graph with self-loops, dense (symmetric) adjacency.
    idx = jnp.arange(N)
    adj = (jnp.zeros((N, N), jnp.float32)
           .at[idx, (idx + 1) % N].set(1.0)
           .at[idx, (idx - 1) % N].set(1.0)
           .at[idx, idx].set(1.0))

    h = jax.random.normal(k_feat, (N, IN_DIM), jnp.float32)
    params = init_params(k_param, IN_DIM, HIDDEN, N_CLASSES)

    y = classifier_forward(adj, h, params)
    jax.block_until_ready(y)

    # Pure-f32 JAX reference for sanity check (in-degree = row sums of A under
    # the `A @ x` message convention; equals column sums for symmetric A).
    deg = jnp.maximum(jnp.sum(adj, axis=1), 1.0)
    norm = (deg ** -0.5).reshape(N, 1)

    def sgconv_ref(x, w, b):
        return ((adj @ (x * norm)) * norm) @ w + b

    h1 = jnp.maximum(sgconv_ref(h, params["w1"], params["b1"]), 0.0)
    h2 = jnp.maximum(sgconv_ref(h1, params["w2"], params["b2"]), 0.0)
    y_ref = jnp.mean(h2, axis=0, keepdims=True) @ params["wc"] + params["bc"]

    assert y.shape == (1, N_CLASSES)
    # Tolerance accounts for the (exact-A) bf16 SpMM operands vs. the f32 ref.
    assert jnp.allclose(y, y_ref, atol=1e-2, rtol=1e-2)
    print("KERNEL_OK")
</pallas_src>

<mosaic_0001>
module attributes {stable_mosaic.version = 11 : i64} {
  func.func @classifier_kernel(%arg0: memref<1x1xi32, #tpu.memory_space<smem>>, %arg1: memref<16x16xbf16, #tpu.memory_space<vmem>>, %arg2: memref<16x128xf32, #tpu.memory_space<vmem>>, %arg3: memref<128x128xf32, #tpu.memory_space<vmem>>, %arg4: memref<1x128xf32, #tpu.memory_space<vmem>>, %arg5: memref<128x256xf32, #tpu.memory_space<vmem>>, %arg6: memref<1x256xf32, #tpu.memory_space<vmem>>, %arg7: memref<256x128xf32, #tpu.memory_space<vmem>>, %arg8: memref<1x128xf32, #tpu.memory_space<vmem>>, %arg9: memref<1x128xf32, #tpu.memory_space<vmem>>) attributes {dimension_semantics = [], scalar_prefetch = 0 : i64, scratch_operands = 0 : i64, tpu.core_type = #tpu.core_type<tc>} {
    %c0 = arith.constant 0 : index
    %c0_0 = arith.constant 0 : index
    %0 = vector.load %arg1[%c0, %c0_0] : memref<16x16xbf16, #tpu.memory_space<vmem>>, vector<16x16xbf16>
    %cst = arith.constant 1.000000e+00 : bf16
    %1 = vector.broadcast %cst : bf16 to vector<16x1xbf16>
    %cst_1 = arith.constant dense<0.000000e+00> : vector<16x1xf32>
    %2 = tpu.matmul %0, %1, %cst_1 {dimension_numbers = #tpu.dot_dimension_numbers<[1], [0], [0], [1], [0, 0, 1, 1], [], []>} : vector<16x16xbf16>, vector<16x1xbf16>, vector<16x1xf32> -> vector<16x1xf32>
    %cst_2 = arith.constant 1.000000e+00 : f32
    %3 = vector.broadcast %cst_2 : f32 to vector<16x1xf32>
    %4 = arith.maximumf %2, %3 : vector<16x1xf32>
    %5 = math.rsqrt %4 : vector<16x1xf32>
    %c0_3 = arith.constant 0 : index
    %c0_4 = arith.constant 0 : index
    %6 = vector.load %arg2[%c0_3, %c0_4] : memref<16x128xf32, #tpu.memory_space<vmem>>, vector<16x128xf32>
    %7 = vector.broadcast %5 : vector<16x1xf32> to vector<16x128xf32>
    %8 = arith.mulf %6, %7 : vector<16x128xf32>
    %9 = arith.truncf %8 : vector<16x128xf32> to vector<16x128xbf16>
    %cst_5 = arith.constant dense<0.000000e+00> : vector<16x128xf32>
    %10 = tpu.matmul %0, %9, %cst_5 {dimension_numbers = #tpu.dot_dimension_numbers<[1], [0], [0], [1], [0, 0, 1, 1], [], []>} : vector<16x16xbf16>, vector<16x128xbf16>, vector<16x128xf32> -> vector<16x128xf32>
    %11 = vector.broadcast %5 : vector<16x1xf32> to vector<16x128xf32>
    %12 = arith.mulf %10, %11 : vector<16x128xf32>
    %c0_6 = arith.constant 0 : index
    %c0_7 = arith.constant 0 : index
    %13 = vector.load %arg3[%c0_6, %c0_7] : memref<128x128xf32, #tpu.memory_space<vmem>>, vector<128x128xf32>
    %cst_8 = arith.constant dense<0.000000e+00> : vector<16x128xf32>
    %14 = tpu.matmul %12, %13, %cst_8 {dimension_numbers = #tpu.dot_dimension_numbers<[1], [0], [0], [1], [0, 0, 1, 1], [], []>} : vector<16x128xf32>, vector<128x128xf32>, vector<16x128xf32> -> vector<16x128xf32>
    %c0_9 = arith.constant 0 : index
    %c0_10 = arith.constant 0 : index
    %15 = vector.load %arg4[%c0_9, %c0_10] : memref<1x128xf32, #tpu.memory_space<vmem>>, vector<1x128xf32>
    %16 = vector.broadcast %15 : vector<1x128xf32> to vector<16x128xf32>
    %17 = arith.addf %14, %16 : vector<16x128xf32>
    %cst_11 = arith.constant 0.000000e+00 : f32
    %18 = vector.broadcast %cst_11 : f32 to vector<16x128xf32>
    %19 = arith.maximumf %17, %18 : vector<16x128xf32>
    %20 = vector.broadcast %5 : vector<16x1xf32> to vector<16x128xf32>
    %21 = arith.mulf %19, %20 : vector<16x128xf32>
    %22 = arith.truncf %21 : vector<16x128xf32> to vector<16x128xbf16>
    %cst_12 = arith.constant dense<0.000000e+00> : vector<16x128xf32>
    %23 = tpu.matmul %0, %22, %cst_12 {dimension_numbers = #tpu.dot_dimension_numbers<[1], [0], [0], [1], [0, 0, 1, 1], [], []>} : vector<16x16xbf16>, vector<16x128xbf16>, vector<16x128xf32> -> vector<16x128xf32>
    %24 = vector.broadcast %5 : vector<16x1xf32> to vector<16x128xf32>
    %25 = arith.mulf %23, %24 : vector<16x128xf32>
    %c0_13 = arith.constant 0 : index
    %c0_14 = arith.constant 0 : index
    %26 = vector.load %arg5[%c0_13, %c0_14] : memref<128x256xf32, #tpu.memory_space<vmem>>, vector<128x256xf32>
    %cst_15 = arith.constant dense<0.000000e+00> : vector<16x256xf32>
    %27 = tpu.matmul %25, %26, %cst_15 {dimension_numbers = #tpu.dot_dimension_numbers<[1], [0], [0], [1], [0, 0, 1, 1], [], []>} : vector<16x128xf32>, vector<128x256xf32>, vector<16x256xf32> -> vector<16x256xf32>
    %c0_16 = arith.constant 0 : index
    %c0_17 = arith.constant 0 : index
    %28 = vector.load %arg6[%c0_16, %c0_17] : memref<1x256xf32, #tpu.memory_space<vmem>>, vector<1x256xf32>
    %29 = vector.broadcast %28 : vector<1x256xf32> to vector<16x256xf32>
    %30 = arith.addf %27, %29 : vector<16x256xf32>
    %cst_18 = arith.constant 0.000000e+00 : f32
    %31 = vector.broadcast %cst_18 : f32 to vector<16x256xf32>
    %32 = arith.maximumf %30, %31 : vector<16x256xf32>
    %c0_19 = arith.constant 0 : index
    %c0_20 = arith.constant 0 : index
    %33 = memref.load %arg0[%c0_19, %c0_20] : memref<1x1xi32, #tpu.memory_space<smem>>
    %34 = tpu.iota {dimensions = array<i32: 0>} : vector<16x1xi32>
    %35 = vector.broadcast %33 : i32 to vector<16x1xi32>
    %36 = arith.cmpi slt, %34, %35 : vector<16x1xi32>
    %37 = arith.extui %36 : vector<16x1xi1> to vector<16x1xi32>
    %38 = arith.sitofp %37 : vector<16x1xi32> to vector<16x1xf32>
    %39 = vector.broadcast %38 : vector<16x1xf32> to vector<16x256xf32>
    %40 = arith.mulf %32, %39 : vector<16x256xf32>
    %cst_21 = arith.constant dense<0.000000e+00> : vector<256xf32>
    %41 = vector.multi_reduction <add>, %40, %cst_21 [0] : vector<16x256xf32> to vector<256xf32>
    %42 = vector.shape_cast %41 : vector<256xf32> to vector<1x256xf32>
    %43 = arith.sitofp %33 : i32 to f32
    %cst_22 = arith.constant 1.000000e+00 : f32
    %44 = arith.divf %cst_22, %43 : f32
    %45 = vector.broadcast %44 : f32 to vector<1x256xf32>
    %46 = arith.mulf %42, %45 : vector<1x256xf32>
    %c0_23 = arith.constant 0 : index
    %c0_24 = arith.constant 0 : index
    %47 = vector.load %arg7[%c0_23, %c0_24] : memref<256x128xf32, #tpu.memory_space<vmem>>, vector<256x128xf32>
    %cst_25 = arith.constant dense<0.000000e+00> : vector<1x128xf32>
    %48 = tpu.matmul %46, %47, %cst_25 {dimension_numbers = #tpu.dot_dimension_numbers<[1], [0], [0], [1], [0, 0, 1, 1], [], []>} : vector<1x256xf32>, vector<256x128xf32>, vector<1x128xf32> -> vector<1x128xf32>
    %c0_26 = arith.constant 0 : index
    %c0_27 = arith.constant 0 : index
    %49 = vector.load %arg8[%c0_26, %c0_27] : memref<1x128xf32, #tpu.memory_space<vmem>>, vector<1x128xf32>
    %50 = arith.addf %48, %49 : vector<1x128xf32>
    %c0_28 = arith.constant 0 : index
    %c0_29 = arith.constant 0 : index
    %51 = vector.load %arg9[%c0_28, %c0_29] : memref<1x128xf32, #tpu.memory_space<vmem>>, vector<1x128xf32>
    tpu.vector_store %arg9[%c0_28, %c0_29], %50 {strides = array<i32>} : memref<1x128xf32, #tpu.memory_space<vmem>>, vector<1x128xf32>,
    return
  }
}

</mosaic_0001>

<bundles_post_ra>
// kernel: tpu_custom_call.1
= control target key start
LH: loop header
LB: loop body
LE: loop exit
PB: predicated region body
PF: predicated region fallthrough
CT: control target
= control target key end

     0   :  { %15 = vsyncpa [#allocation4], 0  ;;  %s1060_s0 = inlined_call_operand.<no memory space> [shape: s32[1,1], index: 0, kind: input, shape index: {}]   ;;  %s1061_s1 = inlined_call_operand.hbm [shape: bf16[16,16], index: 1, kind: input, shape index: {}]   ;;  %s1062_s2 = inlined_call_operand.hbm [shape: f32[16,128], index: 2, kind: input, shape index: {}]   ;;  %s1063_s3 = inlined_call_operand.hbm [shape: f32[128,128], index: 3, kind: input, shape index: {}]   ;;  %s1064_s4 = inlined_call_operand.vmem [shape: f32[1,128], index: 4, kind: input, shape index: {}]   ;;  %s1065_s5 = inlined_call_operand.hbm [shape: f32[128,256], index: 5, kind: input, shape index: {}]   ;;  %s1066_s6 = inlined_call_operand.vmem [shape: f32[1,256], index: 6, kind: input, shape index: {}]   ;;  %s1067_s7 = inlined_call_operand.hbm [shape: f32[256,128], index: 7, kind: input, shape index: {}]   ;;  %s1068_s8 = inlined_call_operand.vmem [shape: f32[1,128], index: 8, kind: input, shape index: {}]   ;;  %s1069_s9 = inlined_call_operand.hbm [shape: f32[1,128], index: 9, kind: output, shape index: {}]  }
   0x1   :  { %16 = vsyncpa [#allocation7], 0 }
   0x2   :  { %17 = vsyncpa [#allocation10], 0 }
   0x3   :  { %18 = vsyncpa [#allocation5], 0  ;;  %s919_s30 = smov [#allocation6]  }
   0x4   :  { %s38_s10 = sshll.u32 %s919_s30, 4  ;;  %s39_s10 = int_to_ptr.vmem [resolvable:$true] %s38_s10 }
   0x5   :  { %s799_s11 = scalar_lea.vmem %s39_s10, 256  ;;  %p804_p1 = scmp.lt.s32.totalorder %s39_s10, %s39_s10 }
   0x6   :  { %p800_p0 = scmp.ne.s32.totalorder %s39_s10, %s799_s11  ;;  %p805_p2 = scmp.lt.s32.totalorder %s799_s11, %s799_s11 }
   0x8   :  { %p806_p3 = por %p805_p2, %p804_p1 }
   0xa   :  { %p807_p4 = pnand %p806_p3, %p800_p0 }
   0xc   :  { %810 = shalt.err (!%p807_p4)
}
   0xd   :  { %s920_s12 = smov 128   ;;  %s921_s13 = smov 8  }
   0xe   :  { %44 = dma.hbm_to_vmem [thread:$0]  %s1062_s2, 256, %s39_s10, [#allocation7], %s920_s12, %s920_s12, %s921_s13  }
   0xf   :  { %s922_s16 = smov [#allocation9]  }
  0x10   :  { %s64_s17 = sshll.u32 %s922_s16, 4  ;;  %s65_s17 = int_to_ptr.vmem [resolvable:$true] %s64_s17 }
  0x11   :  { %s819_s18 = scalar_lea.vmem %s65_s17, 4096  ;;  %p824_p6 = scmp.lt.s32.totalorder %s65_s17, %s65_s17 }
  0x12   :  { %p820_p5 = scmp.ne.s32.totalorder %s65_s17, %s819_s18  ;;  %p825_p7 = scmp.lt.s32.totalorder %s819_s18, %s819_s18 }
  0x14   :  { %p826_p8 = por %p825_p7, %p824_p6 }
  0x16   :  { %p827_p9 = pnand %p826_p8, %p820_p5 }
  0x18   :  { %830 = shalt.err (!%p827_p9)
}
  0x19   :  { %s923_s19 = smov 256   ;;  %s924_s20 = smov 16  }
  0x1a   :  { %70 = dma.hbm_to_vmem [thread:$0]  %s1065_s5, 4096, %s65_s17, [#allocation10], %s923_s19, %s923_s19, %s924_s20  }
  0x1b   :  { %s925_s23 = smov [#allocation3]  }
  0x1c   :  { %s26_s24 = sshll.u32 %s925_s23, 4  ;;  %s27_s24 = int_to_ptr.vmem [resolvable:$true] %s26_s24 }
  0x1d   :  { %s839_s2 = scalar_lea.vmem %s27_s24, 128  ;;  %p844_p11 = scmp.lt.s32.totalorder %s27_s24, %s27_s24 }
  0x1e   :  { %p840_p10 = scmp.ne.s32.totalorder %s27_s24, %s839_s2  ;;  %p845_p12 = scmp.lt.s32.totalorder %s839_s2, %s839_s2 }
  0x20   :  { %p846_p13 = por %p845_p12, %p844_p11 }
  0x22   :  { %p847_p0 = pnand %p846_p13, %p840_p10 }
  0x24   :  { %850 = shalt.err (!%p847_p0)
}
  0x25   :  { %s926_s25 = smov 64   ;;  %s927_s26 = smov 4  }
  0x26   :  { %32 = dma.hbm_to_vmem [thread:$0]  %s1061_s1, 128, %s27_s24, [#allocation4], %s926_s25, %s926_s25, %s927_s26  }
  0x27   :  { %s928_s29 = smov [#allocation8]   ;;  %s929_s5 = smov [#allocation11]  }
  0x28   :  { %s50_s30 = sshll.u32 %s928_s29, 4  ;;  %s78_s10 = sshll.u32 %s929_s5, 4  ;;  %s51_s30 = int_to_ptr.vmem [resolvable:$true] %s50_s30  ;;  %s79_s10 = int_to_ptr.vmem [resolvable:$true] %s78_s10 }
  0x29   :  { %s859_s11 = scalar_lea.vmem %s51_s30, 2048  ;;  %p864_p2 = scmp.lt.s32.totalorder %s51_s30, %s51_s30 }
  0x2a   :  { %p860_p1 = scmp.ne.s32.totalorder %s51_s30, %s859_s11  ;;  %p865_p3 = scmp.lt.s32.totalorder %s859_s11, %s859_s11 }
  0x2c   :  { %p866_p4 = por %p865_p3, %p864_p2 }
  0x2e   :  { %p867_p5 = pnand %p866_p4, %p860_p1 }
  0x30   :  { %870 = shalt.err (!%p867_p5)
}
  0x31   :  { %56 = dma.hbm_to_vmem [thread:$0]  %s1063_s3, 2048, %s51_s30, [#allocation7], %s920_s12, %s920_s12, %s921_s13  }
  0x32   :  { %s879_s1 = scalar_lea.vmem %s79_s10, 4096  ;;  %p884_p7 = scmp.lt.s32.totalorder %s79_s10, %s79_s10 }
  0x33   :  { %p880_p6 = scmp.ne.s32.totalorder %s79_s10, %s879_s1  ;;  %p885_p8 = scmp.lt.s32.totalorder %s879_s1, %s879_s1 }
  0x35   :  { %p886_p9 = por %p885_p8, %p884_p7 }
  0x37   :  { %p887_p10 = pnand %p886_p9, %p880_p6 }
  0x39   :  { %890 = shalt.err (!%p887_p10)
}
  0x3a   :  { %84 = dma.hbm_to_vmem [thread:$0]  %s1067_s7, 4096, %s79_s10, [#allocation10], %s920_s12, %s920_s12, %s921_s13  }
  0x3b   :  { %911 = dma.done.wait [#allocation4], 128  }
  0x3c   :  { %912 = vsyncadd [#allocation4], 4294967168 }
  0x3d   :  { %913 = dma.done.wait [#allocation7], 2304  }
  0x3e   :  { %914 = vsyncadd [#allocation7], 4294964992 }
  0x3f   :  { %915 = dma.done.wait [#allocation10], 8192  }
  0x40   :  { %916 = vsyncadd [#allocation10], 4294959104  ;;  %v930_v0 = vmov 0.0   ;;  %vm931_vm0 = vmmov 0   ;;  %v932_v1 = vmov 1065369472   ;;  %s518_s13 = scvt.s32.f32 %s1060_s0 }
  0x41   :  { %712 = vmatprep.subr.bf16.mxu1 %v930_v0  ;;  %714 = vmatprep.mubr.msk.bf16.mxu1 %vm931_vm0, %v930_v0  ;;  %vm111_vm1 = vcmask 130048   ;;  %v1013_v2 = vld [vmem:[#allocation3] sm:$0xff]   ;;  %v933_v3 = vmov 0   ;;  %v233_v12 = vld [vmem:[#allocation8 + $0x78] sm:$0xff]  ;;  %v232_v13 = vld [vmem:[#allocation8 + $0x70] sm:$0xff]  ;;  %s934_s23 = smov [#allocation12]  }
  0x42   :  { %713 = vmatpush3.bf16.msra.mxu1 %v932_v1  ;;  %783 = vset.pattern.permute.xlu0 %v933_v3  ;;  %v231_v14 = vld [vmem:[#allocation8 + $0x68] sm:$0xff]  ;;  %v230_v15 = vld [vmem:[#allocation8 + $0x60] sm:$0xff]  ;;  %v229_v16 = vld [vmem:[#allocation8 + $0x58] sm:$0xff]  ;;  %s635_s24 = sshll.u32 %s934_s23, 4  ;;  %s636_s24 = int_to_ptr.vmem [resolvable:$true] %s635_s24 }
  0x43   :  { %718 = vmatprep.subr.bf16.mxu1 %v930_v0  ;;  %724 = vmatprep.subr.mxu0 %v233_v12  ;;  %v228_v17 = vld [vmem:[#allocation8 + $0x50] sm:$0xff]  ;;  %v227_v18 = vld [vmem:[#allocation8 + $0x48] sm:$0xff]  ;;  %v226_v19 = vld [vmem:[#allocation8 + $0x40] sm:$0xff]  ;;  %s891_s2 = scalar_lea.vmem %s636_s24, 16  ;;  %s895_s25 = scalar_lea.vmem %s636_s24, 32 }
  0x44   :  { %725 = vmatpush3.msra.mxu0 %v233_v12  ;;  %v225_v20 = vld [vmem:[#allocation8 + $0x38] sm:$0xff]  ;;  %v224_v21 = vld [vmem:[#allocation8 + $0x30] sm:$0xff]  ;;  %v223_v22 = vld [vmem:[#allocation8 + $0x28] sm:$0xff]  ;;  %p892_p11 = scmp.ne.s32.totalorder %s636_s24, %s891_s2  ;;  %p896_p12 = scmp.lt.s32.totalorder %s636_s24, %s636_s24 }
  0x45   :  { %715 = vmatmul.mubr.msk.bf16.vlgmr.msra.gmra.mxu1 %vm111_vm1, %v1013_v2  ;;  %726 = vmatprep.subr.mxu0 %v232_v13  ;;  %v222_v23 = vld [vmem:[#allocation8 + $0x20] sm:$0xff]  ;;  %v221_v24 = vld [vmem:[#allocation8 + $0x18] sm:$0xff]  ;;  %v160_v26 = vld [vmem:[#allocation6] sm:$0xff]  ;;  %p897_p13 = scmp.lt.s32.totalorder %s895_s25, %s891_s2 }
  0x46   :  { %720 = vmatprep.mubr.msk.bf16.mxu1 %vm931_vm0, %v930_v0  ;;  %727 = vmatpush3.msra.mxu0 %v232_v13  ;;  %v161_v27 = vld [vmem:[#allocation6 + $0x8] sm:$0xff]  ;;  %v220_v32 = vld [vmem:[#allocation8 + $0x10] sm:$0xff]  ;;  %v219_v33 = vld [vmem:[#allocation8 + $0x8] sm:$0xff] }
  0x47   :  { %728 = vmatprep.subr.mxu0 %v231_v14  ;;  %v218_v34 = vld [vmem:[#allocation8] sm:$0xff]  ;;  %v649_v41 = vld [vmem:[%s1064_s4] ss:$0 sm:$0xff]  ;;  %v395_v51 = vld [vmem:[#allocation9 + $0xf8] sm:$0xff]  ;;  %p898_p0 = por %p897_p13, %p896_p12 }
  0x48   :  { %729 = vmatpush3.msra.mxu0 %v231_v14  ;;  %v394_v52 = vld [vmem:[#allocation9 + $0xf0] sm:$0xff]  ;;  %v393_v53 = vld [vmem:[#allocation9 + $0xe8] sm:$0xff]  ;;  %v392_v54 = vld [vmem:[#allocation9 + $0xe0] sm:$0xff] }
  0x49   :  { %730 = vmatprep.subr.mxu0 %v230_v15  ;;  %v391_v55 = vld [vmem:[#allocation9 + $0xd8] sm:$0xff]  ;;  %v390_v56 = vld [vmem:[#allocation9 + $0xd0] sm:$0xff]  ;;  %v389_v57 = vld [vmem:[#allocation9 + $0xc8] sm:$0xff]  ;;  %p899_p1 = pnand %p898_p0, %p892_p11 }
  0x4a   :  { %731 = vmatpush3.msra.mxu0 %v230_v15  ;;  %v388_v58 = vld [vmem:[#allocation9 + $0xc0] sm:$0xff]  ;;  %v387_v59 = vld [vmem:[#allocation9 + $0xb8] sm:$0xff]  ;;  %v386_v60 = vld [vmem:[#allocation9 + $0xb0] sm:$0xff] }
  0x4b   :  { %732 = vmatprep.subr.mxu0 %v229_v16  ;;  %v385_v61 = vld [vmem:[#allocation9 + $0xa8] sm:$0xff]  ;;  %v384_v62 = vld [vmem:[#allocation9 + $0xa0] sm:$0xff]  ;;  %v383_v63 = vld [vmem:[#allocation9 + $0x98] sm:$0xff] }
  0x4c   :  { %733 = vmatpush3.msra.mxu0 %v229_v16  ;;  %v382_v1 = vld [vmem:[#allocation9 + $0x90] sm:$0xff]  ;;  %v380_v3 = vld [vmem:[#allocation9 + $0x80] sm:$0xff]  ;;  %v371_v12 = vld [vmem:[#allocation9 + $0x38] sm:$0xff] }
  0x4d   :  { %734 = vmatprep.subr.mxu0 %v228_v17  ;;  %v370_v13 = vld [vmem:[#allocation9 + $0x30] sm:$0xff]  ;;  %v369_v14 = vld [vmem:[#allocation9 + $0x28] sm:$0xff]  ;;  %v368_v15 = vld [vmem:[#allocation9 + $0x20] sm:$0xff] }
  0x4e   :  { %735 = vmatpush3.msra.mxu0 %v228_v17  ;;  %v367_v16 = vld [vmem:[#allocation9 + $0x18] sm:$0xff]  ;;  %v366_v17 = vld [vmem:[#allocation9 + $0x10] sm:$0xff] }
  0x4f   :  { %736 = vmatprep.subr.mxu0 %v227_v18 }
  0x50   :  { %737 = vmatpush3.msra.mxu0 %v227_v18  ;;  %v365_v18 = vld [vmem:[#allocation9 + $0x8] sm:$0xff] }
  0x51   :  { %738 = vmatprep.subr.mxu0 %v226_v19 }
  0x52   :  { %739 = vmatpush3.msra.mxu0 %v226_v19  ;;  %v364_v19 = vld [vmem:[#allocation9] sm:$0xff] }
  0x53   :  { %740 = vmatprep.subr.mxu0 %v225_v20 }
  0x54   :  { %741 = vmatpush3.msra.mxu0 %v225_v20  ;;  %v556_v20 = vld [vmem:[#allocation11 + $0xf8] sm:$0xff] }
  0x55   :  { %742 = vmatprep.subr.mxu0 %v224_v21 }
  0x56   :  { %743 = vmatpush3.msra.mxu0 %v224_v21  ;;  %v540_v21 = vld [vmem:[#allocation11 + $0x78] sm:$0xff] }
  0x57   :  { %744 = vmatprep.subr.mxu0 %v223_v22 }
  0x58   :  { %745 = vmatpush3.msra.mxu0 %v223_v22  ;;  %v519_v22 = vstv %s518_s13 }
  0x59   :  { %746 = vmatprep.subr.mxu0 %v222_v23 }
  0x5a   :  { %747 = vmatpush3.msra.mxu0 %v222_v23 }
  0x5b   :  { %748 = vmatprep.subr.mxu0 %v221_v24 }
  0x5c   :  { %749 = vmatpush3.msra.mxu0 %v221_v24 }
  0x5d   :  { %750 = vmatprep.subr.mxu0 %v220_v32 }
  0x5e   :  { %751 = vmatpush3.msra.mxu0 %v220_v32  ;;  %v555_v32 = vld [vmem:[#allocation11 + $0xf0] sm:$0xff] }
  0x5f   :  { %752 = vmatprep.subr.mxu0 %v219_v33 }
  0x60   :  { %753 = vmatpush3.msra.mxu0 %v219_v33  ;;  %v539_v33 = vld [vmem:[#allocation11 + $0x70] sm:$0xff] }
  0x61   :  { %754 = vmatprep.subr.mxu0 %v218_v34 }
  0x62   :  { %755 = vmatpush3.msra.mxu0 %v218_v34  ;;  %v554_v34 = vld [vmem:[#allocation11 + $0xe8] sm:$0xff] }
  0x63   :  { %677 = vmatprep.subr.mxu0 %v556_v20 }
 0x105   :  { %v149_v4 = vpop.f32.mrf.mxu1 }
 0x106   :  { %v156_v5 = vmax.f32 %v149_v4, 1.0  ;;  %v379_v4 = vld [vmem:[#allocation9 + $0x78] sm:$0xff] }
 0x107   :  { %v716_v6 = vpop.f32.mrf.mxu1 }
 0x108   :  { %785 = vrsqrt.f32 %v156_v5  ;;  %v378_v5 = vld [vmem:[#allocation9 + $0x70] sm:$0xff]  ;;  %v377_v6 = vld [vmem:[#allocation9 + $0x68] sm:$0xff] }
 0x109   :  { %v152_v7 = vpop.f32.mrf.mxu1 }
 0x10a   :  { %v157_v8 = vmax.f32 %v152_v7, 1.0  ;;  %v376_v7 = vld [vmem:[#allocation9 + $0x60] sm:$0xff] }
 0x10b   :  { %v717_v9 = vpop.f32.mrf.mxu1 }
 0x10c   :  { %787 = vrsqrt.f32 %v157_v8  ;;  %v375_v8 = vld [vmem:[#allocation9 + $0x58] sm:$0xff]  ;;  %v374_v9 = vld [vmem:[#allocation9 + $0x50] sm:$0xff] }
 0x10d   :  { %789 = vrcp.f32 %v519_v22 }
 0x115   :  { %v786_v10 = vpop.eup %785 }
 0x116   :  { %164 = vperm.xlu0 %783, %v786_v10   ;;  %v373_v10 = vld [vmem:[#allocation9 + $0x48] sm:$0xff] }
 0x119   :  { %v788_v11 = vpop.eup %787 }
 0x11a   :  { %169 = vperm.xlu0 %783, %v788_v11   ;;  %v372_v11 = vld [vmem:[#allocation9 + $0x40] sm:$0xff]  ;;  %v790_v23 = vpop.eup %789 }
 0x11b   :  { %765 = vpush %v790_v23 }
 0x191   :  { %v1019_v25 = vpop.permute.xlu0 %164 }
 0x192   :  { %v172_v29 = vmul.f32 %v1019_v25, %v160_v26 }
 0x195   :  { %v1021_v28 = vpop.permute.xlu0 %169 }
 0x196   :  { %v173_v30 = vmul.f32 %v1021_v28, %v161_v27 }
 0x198   :  { %v174_v31 = vpack.c.bf16 %v173_v30, %v172_v29 }
 0x19a   :  { %719 = vmatpush3.bf16.msra.mxu1 %v174_v31 }
 0x19b   :  { %759 = vmatprep.subr.bf16.mxu1 %v930_v0 }
 0x19d   :  { %721 = vmatmul.mubr.msk.bf16.vlgmr.msra.gmra.mxu1 %vm111_vm1, %v1013_v2 }
 0x19e   :  { %761 = vmatprep.mubr.msk.bf16.mxu1 %vm931_vm0, %v930_v0 }
 0x25d   :  { %v209_v35 = vpop.f32.mrf.mxu1 }
 0x25e   :  { %v216_v36 = vmul.f32 %v209_v35, %v1019_v25  ;;  %v538_v35 = vld [vmem:[#allocation11 + $0x68] sm:$0xff] }
 0x25f   :  { %v722_v37 = vpop.f32.mrf.mxu1 }
 0x260   :  { %756 = vmatprep.mubr.f32.mxu0 %v216_v36  ;;  %v553_v36 = vld [vmem:[#allocation11 + $0xe0] sm:$0xff]  ;;  %v552_v37 = vld [vmem:[#allocation11 + $0xd8] sm:$0xff] }
 0x261   :  { %v212_v38 = vpop.f32.mrf.mxu1 }
 0x262   :  { %v217_v39 = vmul.f32 %v212_v38, %v1021_v28  ;;  %v536_v38 = vld [vmem:[#allocation11 + $0x58] sm:$0xff] }
 0x263   :  { %v723_v40 = vpop.f32.mrf.mxu1 }
 0x264   :  { %757 = vmatmul.mubr.f32.vlgmr.msra.gmra.mxu0 %v217_v39  ;;  %v551_v39 = vld [vmem:[#allocation11 + $0xd0] sm:$0xff]  ;;  %v550_v40 = vld [vmem:[#allocation11 + $0xc8] sm:$0xff] }
 0x265   :  { %678 = vmatpush3.msra.mxu0 %v540_v21 }
 0x266   :  { %679 = vmatprep.subr.mxu0 %v555_v32 }
 0x267   :  { %680 = vmatpush3.msra.mxu0 %v539_v33 }
 0x268   :  { %681 = vmatprep.subr.mxu0 %v554_v34 }
 0x269   :  { %682 = vmatpush3.msra.mxu0 %v538_v35 }
 0x26a   :  { %683 = vmatprep.subr.mxu0 %v553_v36 }
 0x324   :  { %v758_v42 = vpop.f32.mrf.mxu0 }
 0x325   :  { %v313_v43 = vadd.f32 %v758_v42, %v649_v41  ;;  %v549_v42 = vld [vmem:[#allocation11 + $0xc0] sm:$0xff] }
 0x326   :  { %v307_v44 = vpop.f32.mrf.mxu0 }
 0x327   :  { %v317_v45 = vmax.f32 %v313_v43, 0.0  ;;  %v308_v46 = vadd.f32 %v649_v41, %v307_v44  ;;  %v534_v41 = vld [vmem:[#allocation11 + $0x48] sm:$0xff]  ;;  %v533_v43 = vld [vmem:[#allocation11 + $0x40] sm:$0xff]  ;;  %v548_v44 = vld [vmem:[#allocation11 + $0xb8] sm:$0xff] }
 0x329   :  { %v316_v47 = vmax.f32 %v308_v46, 0.0  ;;  %v319_v48 = vmul.f32 %v317_v45, %v1021_v28  ;;  %v532_v45 = vld [vmem:[#allocation11 + $0x38] sm:$0xff]  ;;  %v547_v46 = vld [vmem:[#allocation11 + $0xb0] sm:$0xff] }
 0x32b   :  { %v318_v49 = vmul.f32 %v316_v47, %v1019_v25  ;;  %v531_v47 = vld [vmem:[#allocation11 + $0x30] sm:$0xff] }
 0x32d   :  { %v320_v50 = vpack.c.bf16 %v319_v48, %v318_v49  ;;  %v546_v48 = vld [vmem:[#allocation11 + $0xa8] sm:$0xff] }
 0x32e   :  { %v530_v49 = vld [vmem:[#allocation11 + $0x28] sm:$0xff] }
 0x32f   :  { %760 = vmatpush3.bf16.msra.mxu1 %v320_v50  ;;  %v545_v50 = vld [vmem:[#allocation11 + $0xa0] sm:$0xff] }
 0x330   :  { %408 = vmatprep.subr.mxu1 %v395_v51  ;;  %v529_v51 = vld [vmem:[#allocation11 + $0x20] sm:$0xff] }
 0x332   :  { %762 = vmatmul.mubr.msk.bf16.vlgmr.msra.gmra.mxu1 %vm111_vm1, %v1013_v2  ;;  %v381_v2 = vld [vmem:[#allocation9 + $0x88] sm:$0xff] }
 0x333   :  { %409 = vmatpush1.msra.mxu1 %v394_v52  ;;  %472 = vmatprep.mubr.f32.mxu1 %v930_v0  ;;  %v544_v52 = vld [vmem:[#allocation11 + $0x98] sm:$0xff] }
 0x334   :  { %410 = vmatprep.subr.mxu1 %v393_v53  ;;  %v528_v53 = vld [vmem:[#allocation11 + $0x18] sm:$0xff] }
 0x335   :  { %411 = vmatpush1.msra.mxu1 %v392_v54  ;;  %v543_v54 = vld [vmem:[#allocation11 + $0x90] sm:$0xff] }
 0x336   :  { %412 = vmatprep.subr.mxu1 %v391_v55  ;;  %v527_v55 = vld [vmem:[#allocation11 + $0x10] sm:$0xff] }
 0x337   :  { %413 = vmatpush1.msra.mxu1 %v390_v56  ;;  %v542_v56 = vld [vmem:[#allocation11 + $0x88] sm:$0xff] }
 0x338   :  { %414 = vmatprep.subr.mxu1 %v389_v57  ;;  %v526_v57 = vld [vmem:[#allocation11 + $0x8] sm:$0xff] }
 0x339   :  { %415 = vmatpush1.msra.mxu1 %v388_v58  ;;  %v541_v58 = vld [vmem:[#allocation11 + $0x80] sm:$0xff] }
 0x33a   :  { %416 = vmatprep.subr.mxu1 %v387_v59  ;;  %v525_v59 = vld [vmem:[#allocation11] sm:$0xff] }
 0x33b   :  { %417 = vmatpush1.msra.mxu1 %v386_v60  ;;  %v398_v60 = vlaneseq }
 0x33c   :  { %418 = vmatprep.subr.mxu1 %v385_v61 }
 0x33d   :  { %419 = vmatpush1.msra.mxu1 %v384_v62  ;;  %v399_v61 = vshrl.u32 %v398_v60, 7 }
 0x33e   :  { %420 = vmatprep.subr.mxu1 %v383_v63  ;;  %v396_v63 = vld [vmem:[%s1066_s6] sm:$0x3] }
 0x33f   :  { %421 = vmatpush1.msra.mxu1 %v382_v1  ;;  %v400_v62 = vsub.s32 0, %v399_v61  ;;  %v404_v1 = vsub.s32 1, %v399_v61 }
 0x340   :  { %422 = vmatprep.subr.mxu1 %v381_v2 }
 0x341   :  { %423 = vmatpush1.msra.mxu1 %v380_v3  ;;  %v401_v2 = vrot.slane %v396_v63, %v400_v62  ;;  %v405_v3 = vrot.slane %v396_v63, %v404_v1 }
 0x342   :  { %424 = vmatprep.subr.mxu1 %v379_v4  ;;  %v492_v4 = vadd.s32 8, %v399_v61 }
 0x343   :  { %425 = vmatpush1.msra.mxu1 %v378_v5 }
 0x344   :  { %426 = vmatprep.subr.mxu1 %v377_v6  ;;  %v493_v6 = vstv %s1060_s0  ;;  %s766_s0 = spop %765 }
 0x345   :  { %427 = vmatpush1.msra.mxu1 %v376_v7  ;;  %vm494_vm2 = vcmp.lt.s32.totalorder %v399_v61, %v493_v6  ;;  %vm495_vm3 = vcmp.lt.s32.totalorder %v492_v4, %v493_v6 }
 0x346   :  { %428 = vmatprep.subr.mxu1 %v375_v8 }
 0x347   :  { %429 = vmatpush1.msra.mxu1 %v374_v9 }
 0x348   :  { %430 = vmatprep.subr.mxu1 %v373_v10 }
 0x349   :  { %431 = vmatpush1.msra.mxu1 %v372_v11 }
 0x34a   :  { %432 = vmatprep.subr.mxu1 %v371_v12 }
 0x34b   :  { %433 = vmatpush1.msra.mxu1 %v370_v13  ;;  %v651_v13 = vsel %vm494_vm2, 1.0, %v930_v0 }
 0x34c   :  { %434 = vmatprep.subr.mxu1 %v369_v14  ;;  %v652_v14 = vsel %vm495_vm3, 1.0, %v930_v0 }
 0x34d   :  { %435 = vmatpush1.msra.mxu1 %v368_v15 }
 0x34e   :  { %436 = vmatprep.subr.mxu1 %v367_v16 }
 0x34f   :  { %437 = vmatpush1.msra.mxu1 %v366_v17 }
 0x350   :  { %438 = vmatprep.subr.mxu1 %v365_v18 }
 0x351   :  { %439 = vmatpush1.msra.mxu1 %v364_v19 }
 0x3f2   :  { %v355_v24 = vpop.f32.mrf.mxu1 }
 0x3f3   :  { %v362_v26 = vmul.f32 %v355_v24, %v1019_v25  ;;  %v537_v25 = vld [vmem:[#allocation11 + $0x60] sm:$0xff] }
 0x3f4   :  { %v763_v27 = vpop.f32.mrf.mxu1  ;;  %684 = vmatpush3.msra.mxu0 %v537_v25 }
 0x3f5   :  { %473 = vmatmul.mubr.f32.vlgmr.msra.gmra.mxu1 %v362_v26  ;;  %685 = vmatprep.subr.mxu0 %v552_v37 }
 0x3f6   :  { %v358_v29 = vpop.f32.mrf.mxu1  ;;  %478 = vmatprep.mubr.f32.mxu1 %v930_v0  ;;  %686 = vmatpush3.msra.mxu0 %v536_v38  ;;  %v522_v38 = vstv %s766_s0 }
 0x3f7   :  { %v363_v30 = vmul.f32 %v358_v29, %v1021_v28  ;;  %687 = vmatprep.subr.mxu0 %v551_v39  ;;  %v535_v28 = vld [vmem:[#allocation11 + $0x50] sm:$0xff] }
 0x3f8   :  { %v764_v31 = vpop.f32.mrf.mxu1  ;;  %688 = vmatpush3.msra.mxu0 %v535_v28 }
 0x3f9   :  { %479 = vmatmul.mubr.f32.gmra.mxu1 %v363_v30  ;;  %689 = vmatprep.subr.mxu0 %v550_v40 }
 0x3fa   :  { %690 = vmatpush3.msra.mxu0 %v534_v41  ;;  %v557_v41 = vld [vmem:[%s1068_s8] sm:$0x1] }
 0x3fb   :  { %691 = vmatprep.subr.mxu0 %v549_v42 }
 0x3fc   :  { %692 = vmatpush3.msra.mxu0 %v533_v43 }
 0x3fd   :  { %693 = vmatprep.subr.mxu0 %v548_v44 }
 0x3fe   :  { %694 = vmatpush3.msra.mxu0 %v532_v45 }
 0x3ff   :  { %695 = vmatprep.subr.mxu0 %v547_v46 }
 0x400   :  { %696 = vmatpush3.msra.mxu0 %v531_v47 }
 0x401   :  { %697 = vmatprep.subr.mxu0 %v546_v48 }
 0x402   :  { %698 = vmatpush3.msra.mxu0 %v530_v49 }
 0x403   :  { %699 = vmatprep.subr.mxu0 %v545_v50 }
 0x404   :  { %700 = vmatpush3.msra.mxu0 %v529_v51 }
 0x405   :  { %701 = vmatprep.subr.mxu0 %v544_v52 }
 0x406   :  { %702 = vmatpush3.msra.mxu0 %v528_v53 }
 0x407   :  { %703 = vmatprep.subr.mxu0 %v543_v54 }
 0x408   :  { %704 = vmatpush3.msra.mxu0 %v527_v55 }
 0x409   :  { %705 = vmatprep.subr.mxu0 %v542_v56 }
 0x40a   :  { %706 = vmatpush3.msra.mxu0 %v526_v57 }
 0x40b   :  { %707 = vmatprep.subr.mxu0 %v541_v58 }
 0x40c   :  { %708 = vmatpush3.msra.mxu0 %v525_v59 }
 0x4b5   :  { %v474_v5 = vpop.f32.mrf.mxu1 }
 0x4b6   :  { %v475_v7 = vadd.f32 %v474_v5, %v401_v2 }
 0x4b7   :  { %v476_v8 = vpop.f32.mrf.mxu1 }
 0x4b8   :  { %v477_v9 = vadd.f32 %v476_v8, %v405_v3  ;;  %v485_v11 = vmax.f32 %v475_v7, 0.0 }
 0x4b9   :  { %v480_v10 = vpop.f32.mrf.mxu1 }
 0x4ba   :  { %v481_v12 = vadd.f32 %v480_v10, %v401_v2  ;;  %v486_v16 = vmax.f32 %v477_v9, 0.0  ;;  %v500_v19 = vmul.f32 %v651_v13, %v485_v11 }
 0x4bb   :  { %v482_v15 = vpop.f32.mrf.mxu1 }
 0x4bc   :  { %v487_v17 = vmax.f32 %v481_v12, 0.0  ;;  %v483_v18 = vadd.f32 %v482_v15, %v405_v3  ;;  %v501_v22 = vmul.f32 %v651_v13, %v486_v16 }
 0x4be   :  { %v502_v20 = vmul.f32 %v652_v14, %v487_v17  ;;  %v488_v21 = vmax.f32 %v483_v18, 0.0 }
 0x4c0   :  { %v504_v23 = vadd.f32 %v502_v20, %v500_v19  ;;  %v503_v24 = vmul.f32 %v652_v14, %v488_v21 }
 0x4c2   :  { %v505_v26 = vrot.slane %v504_v23, 4  ;;  %v511_v27 = vadd.f32 %v503_v24, %v501_v22 }
 0x4c4   :  { %v512_v29 = vrot.slane %v511_v27, 4  ;;  %v506_v30 = vadd.f32 %v505_v26, %v504_v23 }
 0x4c6   :  { %v507_v31 = vrot.slane %v506_v30, 2  ;;  %v513_v32 = vadd.f32 %v512_v29, %v511_v27 }
 0x4c8   :  { %v508_v33 = vadd.f32 %v507_v31, %v506_v30  ;;  %v514_v34 = vrot.slane %v513_v32, 2 }
 0x4ca   :  { %v509_v35 = vrot.slane %v508_v33, 1  ;;  %v515_v0 = vadd.f32 %v514_v34, %v513_v32 }
 0x4cc   :  { %v516_v36 = vrot.slane %v515_v0, 1  ;;  %v510_v25 = vadd.f32 %v509_v35, %v508_v33 }
 0x4ce   :  { %v517_v37 = vadd.f32 %v516_v36, %v515_v0  ;;  %v523_v28 = vmul.f32 %v522_v38, %v510_v25 }
 0x4d0   :  { %v524_v39 = vmul.f32 %v522_v38, %v517_v37 }
 0x4d2   :  { %622 = vmatprep.mubr.f32.mxu0 %v524_v39 }
 0x4d3   :  { %623 = vmatmul.mubr.f32.vlgmr.msra.gmra.mxu0 %v523_v28 }
 0x593   :  { %v709_v40 = vpop.f32.mrf.mxu0 }
 0x595   :  { %v710_v42 = vpop.f32.mrf.mxu0 }
 0x596   :  { %v711_v43 = vadd.f32 %v710_v42, %v709_v40 }
 0x598   :  { %v625_v44 = vadd.f32 %v711_v43, %v557_v41 }
 0x59a   :  { %628 = vst [vmem:[#allocation12] sm:$0x1] %v625_v44 }
 0x59b   :  { %902 = shalt.err (!%p899_p1)
}
 0x59c   :  { %638 = dma.vmem_to_hbm [thread:$0]  %s636_s24, 16, %s1069_s9, [#allocation5]  }
 0x59d   :  { %917 = dma.done.wait [#allocation5], 16  }
 0x59e   :  { %918 = vsyncadd [#allocation5], 4294967280 }
 0x59f   :  { %642 = vsyncpa [#allocation4], 1 }
 0x5a0   :  { %643 = vsyncpa [#allocation7], 1 }
 0x5a1   :  { %644 = vsyncpa [#allocation10], 1 }
 0x5a2   :  { %645 = vsyncpa [#allocation5], 1 }

</bundles_post_ra>
